<compile_context>
chip_gen: v7x
topology: tpu7x:2x2x1
jax: 0.10.0
libtpu: 0.0.40
codegen_flags: <defaults>
</compile_context>

<pallas_src>
import jax
import jax.numpy as jnp
import numpy as np
from jax.experimental import pallas as pl
from jax.experimental.pallas import tpu as pltpu


def _relu(v):
    return jnp.maximum(v, 0.0)


def _cdiv(a, b):
    return -(-a // b)


def _round_up(v, m):
    return (v + m - 1) // m * m


def ppof_fused_kernel(
    x_ref,
    we0, be0, we1, be1, we2, be2,   # shared FCEncoder (3 x Linear+ReLU), biases f32
    wh0, bh0,                       # fused head layer 0: [Wa0 | Wc0]  -> (64, 128)
    wh1, bh1,                       # fused head layer 1: blockdiag(Wa1, Wc1) padded -> (128, 128)
    logit_ref,                      # (TB, A)  exact-width
    value_ref,                      # (TB, 1)  exact-width
):
    f32 = jnp.float32
    cdt = we0.dtype                 # MXU operand dtype (bf16 fast path or f32 parity path)
    A = logit_ref.shape[-1]

    x = x_ref[...].astype(cdt)

    # ---- shared encoder (accumulate in f32, bias/ReLU in f32, re-cast for MXU) ----
    h = _relu(jnp.dot(x, we0[...], preferred_element_type=f32) + be0[...])
    h = _relu(jnp.dot(h.astype(cdt), we1[...], preferred_element_type=f32) + be1[...])
    emb = _relu(jnp.dot(h.astype(cdt), we2[...], preferred_element_type=f32) + be2[...])

    # ---- fused actor+critic heads (one 64x128 GEMM + one 128x128 GEMM) ----
    h0 = _relu(jnp.dot(emb.astype(cdt), wh0[...], preferred_element_type=f32) + bh0[...])
    out = jnp.dot(h0.astype(cdt), wh1[...], preferred_element_type=f32) + bh1[...]

    # Store only the meaningful lanes (exact-width outputs; masked vst, no padded slab).
    logit_ref[...] = out[:, :A].astype(logit_ref.dtype)
    value_ref[...] = out[:, A:A + 1].astype(value_ref.dtype)


def _fuse_head_params(params, head_w):
    """Concat actor/critic head-0, build block-diagonal lane-padded head-1 (f32)."""
    A = params["wa1"].shape[1]
    H = params["wa0"].shape[0]  # 64
    wh0 = jnp.concatenate([params["wa0"], params["wc0"]], axis=1)   # (H, 2H)
    bh0 = jnp.concatenate([params["ba0"], params["bc0"]], axis=1)   # (1, 2H)
    wh1 = jnp.zeros((2 * H, head_w), jnp.float32)
    wh1 = wh1.at[:H, :A].set(params["wa1"])                         # actor -> lanes [0:A]
    wh1 = wh1.at[H:, A:A + 1].set(params["wc1"])                    # critic -> lane A
    bh1 = jnp.zeros((1, head_w), jnp.float32)
    bh1 = bh1.at[:, :A].set(params["ba1"])
    bh1 = bh1.at[:, A:A + 1].set(params["bc1"])
    return wh0, bh0, wh1, bh1


def _derive_batch_tile(B, obs, outw, block_b, bytes_x,
                       vmem_budget=20 * 1024 * 1024):
    """VMEM-budgeted, balanced batch tile (multiple of 16 sublanes)."""
    # Double-buffered x tile + double-buffered exact-width outputs + compiler-materialized
    # f32 intermediates (h:128, emb:64, h0:128, fused out:128 lanes).
    row_bytes = 2 * bytes_x * obs + 2 * 4 * outw + 4 * (128 + 64 + 128 + 128)
    tb_budget = max(16, (vmem_budget // row_bytes) // 16 * 16)
    tb_cap = min(int(block_b), tb_budget)

    n_tiles = max(1, _cdiv(B, tb_cap))
    # v7x megacore: make sure both TensorCores get a tile when there is enough work.
    if B >= 32 and n_tiles < 2:
        n_tiles = 2
    TB = _round_up(_cdiv(B, n_tiles), 16)
    return TB


def _resident_spec(shape):
    """Full-extent, constant-index weight spec; single-buffered when supported."""
    try:
        return pl.BlockSpec(shape, lambda i: (0, 0), pipeline_mode=pl.Buffered(1))
    except TypeError:
        return pl.BlockSpec(shape, lambda i: (0, 0))


def ppof_compute_actor_critic(x, params, block_b=4096, mxu_dtype=jnp.bfloat16):
    """x: (B, obs_dim) float; params: dict of pre-transposed (in,out) weights/biases.

    Returns {'logit': (B, A) f32, 'value': (B, 1) f32}.
    mxu_dtype=jnp.bfloat16 (default) runs MXU operands in bf16 (accumulate f32);
    mxu_dtype=jnp.float32 gives bit-exact parity with the PyTorch reference.
    """
    B, obs = x.shape
    A = params["wa1"].shape[1]
    OUTW = A + 1
    head_w = max(128, _round_up(OUTW, 128))   # fused head-1 GEMM lane width (MXU-efficient)

    cdt = jnp.dtype(mxu_dtype)
    wh0, bh0, wh1, bh1 = _fuse_head_params(params, head_w)

    # Matrices in MXU dtype (halves weight/x DMA for bf16); biases stay f32.
    args = [
        params["we0"].astype(cdt), params["be0"],
        params["we1"].astype(cdt), params["be1"],
        params["we2"].astype(cdt), params["be2"],
        wh0.astype(cdt), bh0,
        wh1.astype(cdt), bh1,
    ]
    x_in = x.astype(cdt)

    TB = _derive_batch_tile(B, obs, OUTW, block_b, x_in.dtype.itemsize)
    Bp = _round_up(B, TB)
    if Bp != B:
        x_in = jnp.pad(x_in, ((0, Bp - B), (0, 0)))
    grid = (Bp // TB,)

    w_specs = [_resident_spec(w.shape) for w in args]

    logit_p, value_p = pl.pallas_call(
        ppof_fused_kernel,
        out_shape=(jax.ShapeDtypeStruct((Bp, A), jnp.float32),
                   jax.ShapeDtypeStruct((Bp, 1), jnp.float32)),
        grid=grid,
        in_specs=[pl.BlockSpec((TB, obs), lambda i: (i, 0))] + w_specs,
        out_specs=(pl.BlockSpec((TB, A), lambda i: (i, 0)),
                   pl.BlockSpec((TB, 1), lambda i: (i, 0))),
        compiler_params=pltpu.CompilerParams(
            dimension_semantics=("parallel",),     # megacore split on v7x; harmless elsewhere
            vmem_limit_bytes=32 * 1024 * 1024,     # tiles budgeted to ~20 MiB -> safe on v7x 64 MiB
        ),
    )(x_in, *args)

    if Bp != B:
        logit_p = logit_p[:B]
        value_p = value_p[:B]
    return {"logit": logit_p, "value": value_p}


def make_params(key, obs_dim, action_dim, enc_sizes=(128, 128, 64), head_hidden=64):
    """Deterministic synthetic init mimicking nn.Linear default (U[-1/sqrt(fan_in), +])."""
    def linear(k, fan_in, fan_out):
        kw, kb = jax.random.split(k)
        bound = 1.0 / np.sqrt(fan_in)
        w = jax.random.uniform(kw, (fan_in, fan_out), jnp.float32, -bound, bound)
        b = jax.random.uniform(kb, (1, fan_out), jnp.float32, -bound, bound)
        return w, b

    keys = jax.random.split(key, 7)
    p = {}
    # FCEncoder: obs -> 128 -> 128 -> 64   (each Linear followed by ReLU)
    p["we0"], p["be0"] = linear(keys[0], obs_dim, enc_sizes[0])
    p["we1"], p["be1"] = linear(keys[1], enc_sizes[0], enc_sizes[1])
    p["we2"], p["be2"] = linear(keys[2], enc_sizes[1], enc_sizes[2])
    # Actor DiscretePolicyHead: 64 -> 64 (ReLU) -> A
    p["wa0"], p["ba0"] = linear(keys[3], head_hidden, head_hidden)
    p["wa1"], p["ba1"] = linear(keys[4], head_hidden, action_dim)
    # Critic RegressionHead: 64 -> 64 (ReLU) -> 1
    p["wc0"], p["bc0"] = linear(keys[5], head_hidden, head_hidden)
    p["wc1"], p["bc1"] = linear(keys[6], head_hidden, 1)
    return p


def reference_forward(x, p):
    relu = lambda v: jnp.maximum(v, 0.0)
    h = relu(x @ p["we0"] + p["be0"])
    h = relu(h @ p["we1"] + p["be1"])
    emb = relu(h @ p["we2"] + p["be2"])
    a = relu(emb @ p["wa0"] + p["ba0"])
    logit = a @ p["wa1"] + p["ba1"]
    c = relu(emb @ p["wc0"] + p["bc0"])
    value = c @ p["wc1"] + p["bc1"]
    return {"logit": logit, "value": value}


if __name__ == "__main__":
    B, OBS, ACT = 8, 8, 4

    key = jax.random.PRNGKey(0)
    k_params, k_x = jax.random.split(key)
    params = make_params(k_params, OBS, ACT)
    x = jax.random.normal(k_x, (B, OBS), jnp.float32)

    ref = reference_forward(x, params)

    # Exact-parity f32 path.
    out32 = ppof_compute_actor_critic(x, params, mxu_dtype=jnp.float32)
    jax.block_until_ready(out32)
    np.testing.assert_allclose(np.asarray(out32["logit"]), np.asarray(ref["logit"]),
                               rtol=1e-5, atol=1e-5)
    np.testing.assert_allclose(np.asarray(out32["value"]), np.asarray(ref["value"]),
                               rtol=1e-5, atol=1e-5)
    assert out32["logit"].shape == (B, ACT) and out32["value"].shape == (B, 1)

    # Fast bf16-MXU path (production default); relaxed tolerance for bf16 operands.
    out16 = ppof_compute_actor_critic(x, params, mxu_dtype=jnp.bfloat16)
    jax.block_until_ready(out16)
    np.testing.assert_allclose(np.asarray(out16["logit"]), np.asarray(ref["logit"]),
                               rtol=5e-2, atol=5e-2)
    np.testing.assert_allclose(np.asarray(out16["value"]), np.asarray(ref["value"]),
                               rtol=5e-2, atol=5e-2)
    assert out16["logit"].shape == (B, ACT) and out16["value"].shape == (B, 1)

    print("KERNEL_OK")
</pallas_src>

<mosaic_0001>
module attributes {stable_mosaic.version = 11 : i64} {
  func.func @ppof_fused_kernel(%arg0: i32, %arg1: memref<16x8xf32, #tpu.memory_space<vmem>>, %arg2: memref<8x128xf32, #tpu.memory_space<vmem>>, %arg3: memref<1x128xf32, #tpu.memory_space<vmem>>, %arg4: memref<128x128xf32, #tpu.memory_space<vmem>>, %arg5: memref<1x128xf32, #tpu.memory_space<vmem>>, %arg6: memref<128x64xf32, #tpu.memory_space<vmem>>, %arg7: memref<1x64xf32, #tpu.memory_space<vmem>>, %arg8: memref<64x128xf32, #tpu.memory_space<vmem>>, %arg9: memref<1x128xf32, #tpu.memory_space<vmem>>, %arg10: memref<128x128xf32, #tpu.memory_space<vmem>>, %arg11: memref<1x128xf32, #tpu.memory_space<vmem>>, %arg12: memref<16x4xf32, #tpu.memory_space<vmem>>, %arg13: memref<16x1xf32, #tpu.memory_space<vmem>>) attributes {dimension_semantics = [#tpu.dimension_semantics<parallel>], iteration_bounds = array<i64: 1>, scalar_prefetch = 0 : i64, scratch_operands = 0 : i64, tpu.core_type = #tpu.core_type<tc>, window_params = [{transform_indices = @transform_0, window_bounds = array<i64: 16, 8>}, {pipeline_mode = #tpu.pipeline_mode<synchronous>, transform_indices = @transform_1, window_bounds = array<i64: 8, 128>}, {pipeline_mode = #tpu.pipeline_mode<synchronous>, transform_indices = @transform_2, window_bounds = array<i64: 1, 128>}, {pipeline_mode = #tpu.pipeline_mode<synchronous>, transform_indices = @transform_3, window_bounds = array<i64: 128, 128>}, {pipeline_mode = #tpu.pipeline_mode<synchronous>, transform_indices = @transform_4, window_bounds = array<i64: 1, 128>}, {pipeline_mode = #tpu.pipeline_mode<synchronous>, transform_indices = @transform_5, window_bounds = array<i64: 128, 64>}, {pipeline_mode = #tpu.pipeline_mode<synchronous>, transform_indices = @transform_6, window_bounds = array<i64: 1, 64>}, {pipeline_mode = #tpu.pipeline_mode<synchronous>, transform_indices = @transform_7, window_bounds = array<i64: 64, 128>}, {pipeline_mode = #tpu.pipeline_mode<synchronous>, transform_indices = @transform_8, window_bounds = array<i64: 1, 128>}, {pipeline_mode = #tpu.pipeline_mode<synchronous>, transform_indices = @transform_9, window_bounds = array<i64: 128, 128>}, {pipeline_mode = #tpu.pipeline_mode<synchronous>, transform_indices = @transform_10, window_bounds = array<i64: 1, 128>}, {transform_indices = @transform_11, window_bounds = array<i64: 16, 4>}, {transform_indices = @transform_12, window_bounds = array<i64: 16, 1>}]} {
    %c0 = arith.constant 0 : index
    %c0_0 = arith.constant 0 : index
    %0 = vector.load %arg1[%c0, %c0_0] : memref<16x8xf32, #tpu.memory_space<vmem>>, vector<16x8xf32>
    %c0_1 = arith.constant 0 : index
    %c0_2 = arith.constant 0 : index
    %1 = vector.load %arg2[%c0_1, %c0_2] : memref<8x128xf32, #tpu.memory_space<vmem>>, vector<8x128xf32>
    %cst = arith.constant dense<0.000000e+00> : vector<16x128xf32>
    %2 = tpu.matmul %0, %1, %cst {dimension_numbers = #tpu.dot_dimension_numbers<[1], [0], [0], [1], [0, 0, 1, 1], [], []>} : vector<16x8xf32>, vector<8x128xf32>, vector<16x128xf32> -> vector<16x128xf32>
    %c0_3 = arith.constant 0 : index
    %c0_4 = arith.constant 0 : index
    %3 = vector.load %arg3[%c0_3, %c0_4] : memref<1x128xf32, #tpu.memory_space<vmem>>, vector<1x128xf32>
    %4 = vector.broadcast %3 : vector<1x128xf32> to vector<16x128xf32>
    %5 = arith.addf %2, %4 : vector<16x128xf32>
    %cst_5 = arith.constant 0.000000e+00 : f32
    %6 = vector.broadcast %cst_5 : f32 to vector<16x128xf32>
    %7 = arith.maximumf %5, %6 : vector<16x128xf32>
    %c0_6 = arith.constant 0 : index
    %c0_7 = arith.constant 0 : index
    %8 = vector.load %arg4[%c0_6, %c0_7] : memref<128x128xf32, #tpu.memory_space<vmem>>, vector<128x128xf32>
    %cst_8 = arith.constant dense<0.000000e+00> : vector<16x128xf32>
    %9 = tpu.matmul %7, %8, %cst_8 {dimension_numbers = #tpu.dot_dimension_numbers<[1], [0], [0], [1], [0, 0, 1, 1], [], []>} : vector<16x128xf32>, vector<128x128xf32>, vector<16x128xf32> -> vector<16x128xf32>
    %c0_9 = arith.constant 0 : index
    %c0_10 = arith.constant 0 : index
    %10 = vector.load %arg5[%c0_9, %c0_10] : memref<1x128xf32, #tpu.memory_space<vmem>>, vector<1x128xf32>
    %11 = vector.broadcast %10 : vector<1x128xf32> to vector<16x128xf32>
    %12 = arith.addf %9, %11 : vector<16x128xf32>
    %cst_11 = arith.constant 0.000000e+00 : f32
    %13 = vector.broadcast %cst_11 : f32 to vector<16x128xf32>
    %14 = arith.maximumf %12, %13 : vector<16x128xf32>
    %c0_12 = arith.constant 0 : index
    %c0_13 = arith.constant 0 : index
    %15 = vector.load %arg6[%c0_12, %c0_13] : memref<128x64xf32, #tpu.memory_space<vmem>>, vector<128x64xf32>
    %cst_14 = arith.constant dense<0.000000e+00> : vector<16x64xf32>
    %16 = tpu.matmul %14, %15, %cst_14 {dimension_numbers = #tpu.dot_dimension_numbers<[1], [0], [0], [1], [0, 0, 1, 1], [], []>} : vector<16x128xf32>, vector<128x64xf32>, vector<16x64xf32> -> vector<16x64xf32>
    %c0_15 = arith.constant 0 : index
    %c0_16 = arith.constant 0 : index
    %17 = vector.load %arg7[%c0_15, %c0_16] : memref<1x64xf32, #tpu.memory_space<vmem>>, vector<1x64xf32>
    %18 = vector.broadcast %17 : vector<1x64xf32> to vector<16x64xf32>
    %19 = arith.addf %16, %18 : vector<16x64xf32>
    %cst_17 = arith.constant 0.000000e+00 : f32
    %20 = vector.broadcast %cst_17 : f32 to vector<16x64xf32>
    %21 = arith.maximumf %19, %20 : vector<16x64xf32>
    %c0_18 = arith.constant 0 : index
    %c0_19 = arith.constant 0 : index
    %22 = vector.load %arg8[%c0_18, %c0_19] : memref<64x128xf32, #tpu.memory_space<vmem>>, vector<64x128xf32>
    %cst_20 = arith.constant dense<0.000000e+00> : vector<16x128xf32>
    %23 = tpu.matmul %21, %22, %cst_20 {dimension_numbers = #tpu.dot_dimension_numbers<[1], [0], [0], [1], [0, 0, 1, 1], [], []>} : vector<16x64xf32>, vector<64x128xf32>, vector<16x128xf32> -> vector<16x128xf32>
    %c0_21 = arith.constant 0 : index
    %c0_22 = arith.constant 0 : index
    %24 = vector.load %arg9[%c0_21, %c0_22] : memref<1x128xf32, #tpu.memory_space<vmem>>, vector<1x128xf32>
    %25 = vector.broadcast %24 : vector<1x128xf32> to vector<16x128xf32>
    %26 = arith.addf %23, %25 : vector<16x128xf32>
    %cst_23 = arith.constant 0.000000e+00 : f32
    %27 = vector.broadcast %cst_23 : f32 to vector<16x128xf32>
    %28 = arith.maximumf %26, %27 : vector<16x128xf32>
    %c0_24 = arith.constant 0 : index
    %c0_25 = arith.constant 0 : index
    %29 = vector.load %arg10[%c0_24, %c0_25] : memref<128x128xf32, #tpu.memory_space<vmem>>, vector<128x128xf32>
    %cst_26 = arith.constant dense<0.000000e+00> : vector<16x128xf32>
    %30 = tpu.matmul %28, %29, %cst_26 {dimension_numbers = #tpu.dot_dimension_numbers<[1], [0], [0], [1], [0, 0, 1, 1], [], []>} : vector<16x128xf32>, vector<128x128xf32>, vector<16x128xf32> -> vector<16x128xf32>
    %c0_27 = arith.constant 0 : index
    %c0_28 = arith.constant 0 : index
    %31 = vector.load %arg11[%c0_27, %c0_28] : memref<1x128xf32, #tpu.memory_space<vmem>>, vector<1x128xf32>
    %32 = vector.broadcast %31 : vector<1x128xf32> to vector<16x128xf32>
    %33 = arith.addf %30, %32 : vector<16x128xf32>
    %34 = vector.extract_strided_slice %33 {offsets = [0, 0], sizes = [16, 4], strides = [1, 1]} : vector<16x128xf32> to vector<16x4xf32>
    %c0_29 = arith.constant 0 : index
    %c0_30 = arith.constant 0 : index
    %35 = vector.load %arg12[%c0_29, %c0_30] : memref<16x4xf32, #tpu.memory_space<vmem>>, vector<16x4xf32>
    tpu.vector_store %arg12[%c0_29, %c0_30], %34 {strides = array<i32>} : memref<16x4xf32, #tpu.memory_space<vmem>>, vector<16x4xf32>,
    %36 = vector.extract_strided_slice %33 {offsets = [0, 4], sizes = [16, 1], strides = [1, 1]} : vector<16x128xf32> to vector<16x1xf32>
    %c0_31 = arith.constant 0 : index
    %c0_32 = arith.constant 0 : index
    %37 = vector.load %arg13[%c0_31, %c0_32] : memref<16x1xf32, #tpu.memory_space<vmem>>, vector<16x1xf32>
    tpu.vector_store %arg13[%c0_31, %c0_32], %36 {strides = array<i32>} : memref<16x1xf32, #tpu.memory_space<vmem>>, vector<16x1xf32>,
    return
  }
  func.func @transform_0(%arg0: i32) -> (i32, i32) {
    %c0_i32 = arith.constant 0 : i32
    %c0_i32_0 = arith.constant 0 : i32
    return %arg0, %c0_i32 : i32, i32
  }
  func.func @transform_1(%arg0: i32) -> (i32, i32) {
    %c0_i32 = arith.constant 0 : i32
    %c0_i32_0 = arith.constant 0 : i32
    %c0_i32_1 = arith.constant 0 : i32
    return %c0_i32, %c0_i32_0 : i32, i32
  }
  func.func @transform_2(%arg0: i32) -> (i32, i32) {
    %c0_i32 = arith.constant 0 : i32
    %c0_i32_0 = arith.constant 0 : i32
    %c0_i32_1 = arith.constant 0 : i32
    return %c0_i32, %c0_i32_0 : i32, i32
  }
  func.func @transform_3(%arg0: i32) -> (i32, i32) {
    %c0_i32 = arith.constant 0 : i32
    %c0_i32_0 = arith.constant 0 : i32
    %c0_i32_1 = arith.constant 0 : i32
    return %c0_i32, %c0_i32_0 : i32, i32
  }
  func.func @transform_4(%arg0: i32) -> (i32, i32) {
    %c0_i32 = arith.constant 0 : i32
    %c0_i32_0 = arith.constant 0 : i32
    %c0_i32_1 = arith.constant 0 : i32
    return %c0_i32, %c0_i32_0 : i32, i32
  }
  func.func @transform_5(%arg0: i32) -> (i32, i32) {
    %c0_i32 = arith.constant 0 : i32
    %c0_i32_0 = arith.constant 0 : i32
    %c0_i32_1 = arith.constant 0 : i32
    return %c0_i32, %c0_i32_0 : i32, i32
  }
  func.func @transform_6(%arg0: i32) -> (i32, i32) {
    %c0_i32 = arith.constant 0 : i32
    %c0_i32_0 = arith.constant 0 : i32
    %c0_i32_1 = arith.constant 0 : i32
    return %c0_i32, %c0_i32_0 : i32, i32
  }
  func.func @transform_7(%arg0: i32) -> (i32, i32) {
    %c0_i32 = arith.constant 0 : i32
    %c0_i32_0 = arith.constant 0 : i32
    %c0_i32_1 = arith.constant 0 : i32
    return %c0_i32, %c0_i32_0 : i32, i32
  }
  func.func @transform_8(%arg0: i32) -> (i32, i32) {
    %c0_i32 = arith.constant 0 : i32
    %c0_i32_0 = arith.constant 0 : i32
    %c0_i32_1 = arith.constant 0 : i32
    return %c0_i32, %c0_i32_0 : i32, i32
  }
  func.func @transform_9(%arg0: i32) -> (i32, i32) {
    %c0_i32 = arith.constant 0 : i32
    %c0_i32_0 = arith.constant 0 : i32
    %c0_i32_1 = arith.constant 0 : i32
    return %c0_i32, %c0_i32_0 : i32, i32
  }
  func.func @transform_10(%arg0: i32) -> (i32, i32) {
    %c0_i32 = arith.constant 0 : i32
    %c0_i32_0 = arith.constant 0 : i32
    %c0_i32_1 = arith.constant 0 : i32
    return %c0_i32, %c0_i32_0 : i32, i32
  }
  func.func @transform_11(%arg0: i32) -> (i32, i32) {
    %c0_i32 = arith.constant 0 : i32
    %c0_i32_0 = arith.constant 0 : i32
    return %arg0, %c0_i32 : i32, i32
  }
  func.func @transform_12(%arg0: i32) -> (i32, i32) {
    %c0_i32 = arith.constant 0 : i32
    %c0_i32_0 = arith.constant 0 : i32
    return %arg0, %c0_i32 : i32, i32
  }
}

</mosaic_0001>

<bundles_post_ra>
// kernel: tpu_custom_call.1
= control target key start
LH: loop header
LB: loop body
LE: loop exit
PB: predicated region body
PF: predicated region fallthrough
CT: control target
= control target key end

     0   :  { %18 = vsyncpa [#allocation3], 0  ;;  %s913_s21 = smov [#allocation2]   ;;  %s1150_s0 = inlined_call_operand.vmem [shape: f32[16,8], index: 0, kind: input, shape index: {}]   ;;  %s1151_s1 = inlined_call_operand.vmem [shape: f32[8,128], index: 1, kind: input, shape index: {}]   ;;  %s1152_s2 = inlined_call_operand.vmem [shape: f32[1,128], index: 2, kind: input, shape index: {}]   ;;  %s1153_s3 = inlined_call_operand.vmem [shape: f32[128,128], index: 3, kind: input, shape index: {}]   ;;  %s1154_s4 = inlined_call_operand.vmem [shape: f32[1,128], index: 4, kind: input, shape index: {}]   ;;  %s1155_s5 = inlined_call_operand.vmem [shape: f32[128,64], index: 5, kind: input, shape index: {}]   ;;  %s1156_s6 = inlined_call_operand.vmem [shape: f32[1,64], index: 6, kind: input, shape index: {}]   ;;  %s1157_s7 = inlined_call_operand.vmem [shape: f32[64,128], index: 7, kind: input, shape index: {}]   ;;  %s1158_s8 = inlined_call_operand.vmem [shape: f32[1,128], index: 8, kind: input, shape index: {}]   ;;  %s1159_s9 = inlined_call_operand.hbm [shape: f32[128,128], index: 9, kind: input, shape index: {}]   ;;  %s1160_s10 = inlined_call_operand.vmem [shape: f32[1,128], index: 10, kind: input, shape index: {}]   ;;  %s1161_s11 = inlined_call_operand.vmem [shape: f32[16,4], index: 11, kind: output, shape index: {0}]   ;;  %s1162_s12 = inlined_call_operand.vmem [shape: f32[16,1], index: 12, kind: output, shape index: {1}]  }
   0x1   :  { %s42_s22 = sshll.u32 %s913_s21, 4  ;;  %s889_s25 = scalar_lea.hbm %s1159_s9, 2048  ;;  %s43_s22 = int_to_ptr.vmem [resolvable:$true] %s42_s22 }
   0x2   :  { %p890_p0 = scmp.ne.s32.totalorder %s1159_s9, %s889_s25  ;;  %p893_p1 = scmp.lt.u32.totalorder %s889_s25, %s1159_s9 }
   0x4   :  { %p895_p2 = pnand %p893_p1, %p890_p0 }
   0x6   :  { %898 = shalt.err (!%p895_p2)
}
   0x7   :  { %s899_s30 = scalar_lea.vmem %s43_s22, 2048  ;;  %p904_p4 = scmp.lt.s32.totalorder %s43_s22, %s43_s22 }
   0x8   :  { %p900_p3 = scmp.ne.s32.totalorder %s43_s22, %s899_s30  ;;  %p905_p5 = scmp.lt.s32.totalorder %s899_s30, %s899_s30 }
   0xa   :  { %p906_p6 = por %p905_p5, %p904_p4 }
   0xc   :  { %p907_p7 = pnand %p906_p6, %p900_p3 }
   0xe   :  { %910 = shalt.err (!%p907_p7)
}
   0xf   :  { %s914_s13 = smov 128   ;;  %s915_s14 = smov 8  }
  0x10   :  { %48 = dma.hbm_to_vmem [thread:$0]  %s1159_s9, 2048, %s43_s22, [#allocation3], %s914_s13, %s914_s13, %s915_s14  }
  0x11   :  { %911 = dma.done.wait [#allocation3], 2048  }
  0x12   :  { %912 = vsyncadd [#allocation3], 4294965248  ;;  %vm64_vm0 = vcmask 64512   ;;  %v56_v0 = vld [vmem:[%s1151_s1] sm:$0xff]  ;;  %v55_v2 = vld [vmem:[%s1150_s0 + $0x8] sm:$0xff]  ;;  %vm363_vm1 = vcmask 523264  }
  0x13   :  { %v54_v1 = vld [vmem:[%s1150_s0] sm:$0xff]  ;;  %644 = vmatprep.subr.mxu1 %v56_v0  ;;  %v149_v4 = vld [vmem:[%s1153_s3 + $0x8] sm:$0xff]  ;;  %v150_v5 = vld [vmem:[%s1153_s3 + $0x10] sm:$0xff]  ;;  %vm545_vm2 = vcmask 31744   ;;  %vm556_vm3 = vcmask 7168  }
  0x14   :  { %646 = vmatprep.mubr.msk.f32.mxu1 %vm64_vm0, %v54_v1  ;;  %v148_v3 = vld [vmem:[%s1153_s3] sm:$0xff]  ;;  %645 = vmatpush3.msra.mxu1 %v56_v0  ;;  %v151_v7 = vld [vmem:[%s1153_s3 + $0x18] sm:$0xff]  ;;  %v153_v10 = vld [vmem:[%s1153_s3 + $0x28] sm:$0xff] }
  0x15   :  { %v773_v6 = vpack.c.bf16 %v149_v4, %v148_v3  ;;  %647 = vmatmul.mubr.msk.f32.vlgmr.msra.gmra.mrb[0].mxu1 %vm64_vm0, %v55_v2  ;;  %v777_v8 = vpack.c.bf16 %v151_v7, %v150_v5  ;;  %v152_v9 = vld [vmem:[%s1153_s3 + $0x20] sm:$0xff]  ;;  %v154_v12 = vld [vmem:[%s1153_s3 + $0x30] sm:$0xff]  ;;  %v155_v13 = vld [vmem:[%s1153_s3 + $0x38] sm:$0xff] }
  0x16   :  { %v781_v11 = vpack.c.bf16 %v153_v10, %v152_v9  ;;  %v785_v14 = vpack.c.bf16 %v155_v13, %v154_v12  ;;  %v156_v15 = vld [vmem:[%s1153_s3 + $0x40] sm:$0xff]  ;;  %v157_v16 = vld [vmem:[%s1153_s3 + $0x48] sm:$0xff]  ;;  %v158_v18 = vld [vmem:[%s1153_s3 + $0x50] sm:$0xff] }
  0x17   :  { %774 = vmatprep.subr.bf16.mxu1 %v773_v6  ;;  %v789_v17 = vpack.c.bf16 %v157_v16, %v156_v15  ;;  %v159_v19 = vld [vmem:[%s1153_s3 + $0x58] sm:$0xff]  ;;  %v160_v21 = vld [vmem:[%s1153_s3 + $0x60] sm:$0xff]  ;;  %v161_v22 = vld [vmem:[%s1153_s3 + $0x68] sm:$0xff] }
  0x18   :  { %776 = vmatpush3.bf16.msra.mxu1 %v773_v6  ;;  %v793_v20 = vpack.c.bf16 %v159_v19, %v158_v18  ;;  %v797_v23 = vpack.c.bf16 %v161_v22, %v160_v21  ;;  %v162_v24 = vld [vmem:[%s1153_s3 + $0x70] sm:$0xff]  ;;  %v163_v25 = vld [vmem:[%s1153_s3 + $0x78] sm:$0xff]  ;;  %v248_v27 = vld [vmem:[%s1155_s5] sm:$0xff] }
  0x19   :  { %778 = vmatprep.subr.bf16.mxu1 %v777_v8  ;;  %v801_v26 = vpack.c.bf16 %v163_v25, %v162_v24  ;;  %v249_v28 = vld [vmem:[%s1155_s5 + $0x8] sm:$0xff]  ;;  %v250_v29 = vld [vmem:[%s1155_s5 + $0x10] sm:$0xff]  ;;  %v251_v31 = vld [vmem:[%s1155_s5 + $0x18] sm:$0xff] }
  0x1a   :  { %v805_v30 = vpack.c.bf16 %v249_v28, %v248_v27  ;;  %v809_v32 = vpack.c.bf16 %v251_v31, %v250_v29  ;;  %v252_v33 = vld [vmem:[%s1155_s5 + $0x20] sm:$0xff]  ;;  %v253_v34 = vld [vmem:[%s1155_s5 + $0x28] sm:$0xff]  ;;  %v254_v36 = vld [vmem:[%s1155_s5 + $0x30] sm:$0xff] }
  0x1b   :  { %v813_v35 = vpack.c.bf16 %v253_v34, %v252_v33  ;;  %v255_v37 = vld [vmem:[%s1155_s5 + $0x38] sm:$0xff]  ;;  %v256_v39 = vld [vmem:[%s1155_s5 + $0x40] sm:$0xff]  ;;  %v257_v40 = vld [vmem:[%s1155_s5 + $0x48] sm:$0xff] }
  0x1c   :  { %780 = vmatpush3.bf16.msra.mxu1 %v777_v8  ;;  %806 = vmatprep.subr.bf16.mxu0 %v805_v30  ;;  %v817_v38 = vpack.c.bf16 %v255_v37, %v254_v36  ;;  %v821_v41 = vpack.c.bf16 %v257_v40, %v256_v39  ;;  %v258_v42 = vld [vmem:[%s1155_s5 + $0x50] sm:$0xff]  ;;  %v259_v43 = vld [vmem:[%s1155_s5 + $0x58] sm:$0xff]  ;;  %v260_v45 = vld [vmem:[%s1155_s5 + $0x60] sm:$0xff] }
  0x1d   :  { %782 = vmatprep.subr.bf16.mxu1 %v781_v11  ;;  %808 = vmatpush3.bf16.msra.mxu0 %v805_v30  ;;  %v825_v44 = vpack.c.bf16 %v259_v43, %v258_v42  ;;  %v261_v46 = vld [vmem:[%s1155_s5 + $0x68] sm:$0xff]  ;;  %v568_v48 = vld [vmem:[%s1152_s2] ss:$0 sm:$0xff]  ;;  %v262_v55 = vld [vmem:[%s1155_s5 + $0x70] sm:$0xff]  ;;  %s916_s2 = smov 124  }
  0x1e   :  { %810 = vmatprep.subr.bf16.mxu0 %v809_v32  ;;  %v829_v47 = vpack.c.bf16 %v261_v46, %v260_v45  ;;  %v263_v56 = vld [vmem:[%s1155_s5 + $0x78] sm:$0xff]  ;;  %v348_v58 = vld [vmem:[%s1157_s7] sm:$0xff]  ;;  %v349_v59 = vld [vmem:[%s1157_s7 + $0x8] sm:$0xff] }
  0x1f   :  { %v833_v57 = vpack.c.bf16 %v263_v56, %v262_v55  ;;  %v350_v60 = vld [vmem:[%s1157_s7 + $0x10] sm:$0xff]  ;;  %v837_v61 = vpack.c.bf16 %v349_v59, %v348_v58  ;;  %v351_v62 = vld [vmem:[%s1157_s7 + $0x18] sm:$0xff]  ;;  %v352_v0 = vld [vmem:[%s1157_s7 + $0x20] sm:$0xff] }
  0x20   :  { %784 = vmatpush3.bf16.msra.mxu1 %v781_v11  ;;  %v841_v63 = vpack.c.bf16 %v351_v62, %v350_v60  ;;  %v353_v1 = vld [vmem:[%s1157_s7 + $0x28] sm:$0xff]  ;;  %v571_v3 = vld [vmem:[%s1154_s4] ss:$0 sm:$0xff]  ;;  %v354_v10 = vld [vmem:[%s1157_s7 + $0x30] sm:$0xff] }
  0x21   :  { %786 = vmatprep.subr.bf16.mxu1 %v785_v14  ;;  %812 = vmatpush3.bf16.msra.mxu0 %v809_v32  ;;  %v845_v2 = vpack.c.bf16 %v353_v1, %v352_v0  ;;  %v355_v11 = vld [vmem:[%s1157_s7 + $0x38] sm:$0xff]  ;;  %v447_v13 = vld [vmem:[#allocation2] sm:$0xff]  ;;  %v449_v15 = vld [vmem:[#allocation2 + $0x10] sm:$0xff] }
  0x22   :  { %814 = vmatprep.subr.bf16.mxu0 %v813_v35  ;;  %v849_v12 = vpack.c.bf16 %v355_v11, %v354_v10  ;;  %v451_v19 = vld [vmem:[#allocation2 + $0x20] sm:$0xff]  ;;  %v453_v22 = vld [vmem:[#allocation2 + $0x30] sm:$0xff]  ;;  %v458_v29 = vld [vmem:[#allocation2 + $0x58] sm:$0xff] }
  0x23   :  { %v455_v25 = vld [vmem:[#allocation2 + $0x40] sm:$0xff]  ;;  %v457_v28 = vld [vmem:[#allocation2 + $0x50] sm:$0xff]  ;;  %v460_v32 = vld [vmem:[#allocation2 + $0x68] sm:$0xff] }
  0x24   :  { %788 = vmatpush3.bf16.msra.mxu1 %v785_v14  ;;  %v448_v14 = vld [vmem:[#allocation2 + $0x8] sm:$0xff]  ;;  %v873_v30 = vpack.c.bf16 %v458_v29, %v457_v28  ;;  %v459_v31 = vld [vmem:[#allocation2 + $0x60] sm:$0xff]  ;;  %v462_v42 = vld [vmem:[#allocation2 + $0x78] sm:$0xff] }
  0x25   :  { %790 = vmatprep.subr.bf16.mxu1 %v789_v17  ;;  %816 = vmatpush3.bf16.msra.mxu0 %v813_v35  ;;  %v853_v16 = vpack.c.bf16 %v448_v14, %v447_v13  ;;  %v877_v33 = vpack.c.bf16 %v460_v32, %v459_v31  ;;  %v572_v34 = vld [vmem:[%s1156_s6] ss:$0 sm:$0xff] }
  0x26   :  { %818 = vmatprep.subr.bf16.mxu0 %v817_v38 }
  0x28   :  { %792 = vmatpush3.bf16.msra.mxu1 %v789_v17  ;;  %v450_v17 = vld [vmem:[#allocation2 + $0x18] sm:$0xff] }
  0x29   :  { %794 = vmatprep.subr.bf16.mxu1 %v793_v20  ;;  %820 = vmatpush3.bf16.msra.mxu0 %v817_v38  ;;  %v857_v18 = vpack.c.bf16 %v450_v17, %v449_v15 }
  0x2a   :  { %822 = vmatprep.subr.bf16.mxu0 %v821_v41 }
  0x2c   :  { %796 = vmatpush3.bf16.msra.mxu1 %v793_v20  ;;  %v452_v20 = vld [vmem:[#allocation2 + $0x28] sm:$0xff] }
  0x2d   :  { %798 = vmatprep.subr.bf16.mxu1 %v797_v23  ;;  %824 = vmatpush3.bf16.msra.mxu0 %v821_v41  ;;  %v861_v21 = vpack.c.bf16 %v452_v20, %v451_v19  ;;  %v461_v41 = vld [vmem:[#allocation2 + $0x70] sm:$0xff] }
  0x2e   :  { %826 = vmatprep.subr.bf16.mxu0 %v825_v44  ;;  %v881_v43 = vpack.c.bf16 %v462_v42, %v461_v41 }
  0x30   :  { %800 = vmatpush3.bf16.msra.mxu1 %v797_v23  ;;  %v454_v23 = vld [vmem:[#allocation2 + $0x38] sm:$0xff] }
  0x31   :  { %802 = vmatprep.subr.bf16.mxu1 %v801_v26  ;;  %828 = vmatpush3.bf16.msra.mxu0 %v825_v44  ;;  %v865_v24 = vpack.c.bf16 %v454_v23, %v453_v22  ;;  %v573_v44 = vld [vmem:[%s1158_s8] ss:$0 sm:$0xff] }
  0x32   :  { %830 = vmatprep.subr.bf16.mxu0 %v829_v47 }
  0x34   :  { %804 = vmatpush3.bf16.msra.mxu1 %v801_v26  ;;  %v456_v26 = vld [vmem:[#allocation2 + $0x48] sm:$0xff] }
  0x35   :  { %832 = vmatpush3.bf16.msra.mxu0 %v829_v47  ;;  %838 = vmatprep.subr.bf16.mxu1 %v837_v61  ;;  %v869_v27 = vpack.c.bf16 %v456_v26, %v455_v25 }
  0x36   :  { %834 = vmatprep.subr.bf16.mxu0 %v833_v57 }
  0x39   :  { %836 = vmatpush3.bf16.msra.mxu0 %v833_v57 }
  0x3a   :  { %854 = vmatprep.subr.bf16.mxu0 %v853_v16 }
  0xe8   :  { %v648_v49 = vpop.f32.mrb[0].mxu1 }
  0xe9   :  { %v143_v50 = vadd.f32 %v648_v49, %v568_v48  ;;  %v137_v51 = vpop.f32.mrb[1].mxu1 }
  0xea   :  { %v138_v52 = vadd.f32 %v568_v48, %v137_v51  ;;  %v576_v51 = vld [vmem:[%s1160_s10] ss:$0 sm:$0xff] }
  0xeb   :  { %v147_v54 = vmax.f32 %v143_v50, 0.0 }
  0xec   :  { %v146_v53 = vmax.f32 %v138_v52, 0.0 }
  0xee   :  { %681 = vmatprep.mubr.f32.mxu1 %v146_v53 }
  0xef   :  { %682 = vmatmul.mubr.f32.vlgmr.msra.gmra.mrb[2].mxu1 %v147_v54 }
  0xf0   :  { %840 = vmatpush3.bf16.msra.mxu1 %v837_v61 }
  0xf1   :  { %842 = vmatprep.subr.bf16.mxu1 %v841_v63 }
  0xf4   :  { %844 = vmatpush3.bf16.msra.mxu1 %v841_v63 }
  0xf5   :  { %846 = vmatprep.subr.bf16.mxu1 %v845_v2 }
  0xf8   :  { %848 = vmatpush3.bf16.msra.mxu1 %v845_v2 }
  0xf9   :  { %850 = vmatprep.subr.bf16.mxu1 %v849_v12 }
  0xfc   :  { %852 = vmatpush3.bf16.msra.mxu1 %v849_v12 }
 0x1c2   :  { %v683_v4 = vpop.f32.mrb[2].mxu1 }
 0x1c3   :  { %v243_v5 = vadd.f32 %v683_v4, %v571_v3  ;;  %v237_v6 = vpop.f32.mrb[3].mxu1 }
 0x1c4   :  { %v238_v7 = vadd.f32 %v571_v3, %v237_v6 }
 0x1c5   :  { %v247_v9 = vmax.f32 %v243_v5, 0.0 }
 0x1c6   :  { %v246_v8 = vmax.f32 %v238_v7, 0.0 }
 0x1c8   :  { %716 = vmatprep.mubr.f32.mxu0 %v246_v8 }
 0x1c9   :  { %717 = vmatmul.mubr.f32.vlgmr.msra.gmra.mrb[0].mxu0 %v247_v9 }
 0x1ca   :  { %856 = vmatpush3.bf16.msra.mxu0 %v853_v16 }
 0x1cb   :  { %858 = vmatprep.subr.bf16.mxu0 %v857_v18 }
 0x1ce   :  { %860 = vmatpush3.bf16.msra.mxu0 %v857_v18 }
 0x1cf   :  { %862 = vmatprep.subr.bf16.mxu0 %v861_v21 }
 0x1d2   :  { %864 = vmatpush3.bf16.msra.mxu0 %v861_v21 }
 0x1d3   :  { %866 = vmatprep.subr.bf16.mxu0 %v865_v24 }
 0x1d6   :  { %868 = vmatpush3.bf16.msra.mxu0 %v865_v24 }
 0x1d7   :  { %870 = vmatprep.subr.bf16.mxu0 %v869_v27 }
 0x1da   :  { %872 = vmatpush3.bf16.msra.mxu0 %v869_v27 }
 0x1db   :  { %874 = vmatprep.subr.bf16.mxu0 %v873_v30 }
 0x1de   :  { %876 = vmatpush3.bf16.msra.mxu0 %v873_v30 }
 0x1df   :  { %878 = vmatprep.subr.bf16.mxu0 %v877_v33 }
 0x1e2   :  { %880 = vmatpush3.bf16.msra.mxu0 %v877_v33 }
 0x1e3   :  { %882 = vmatprep.subr.bf16.mxu0 %v881_v43 }
 0x1e6   :  { %884 = vmatpush3.bf16.msra.mxu0 %v881_v43 }
 0x29c   :  { %v718_v35 = vpop.f32.mrb[0].mxu0 }
 0x29d   :  { %v343_v36 = vadd.f32 %v718_v35, %v572_v34  ;;  %v337_v37 = vpop.f32.mrb[1].mxu0 }
 0x29e   :  { %v338_v38 = vadd.f32 %v572_v34, %v337_v37 }
 0x29f   :  { %v347_v40 = vmax.f32 %v343_v36, 0.0 }
 0x2a0   :  { %v346_v39 = vmax.f32 %v338_v38, 0.0 }
 0x2a2   :  { %735 = vmatprep.mubr.msk.f32.mxu1 %vm363_vm1, %v346_v39 }
 0x2a3   :  { %736 = vmatmul.mubr.msk.f32.vlgmr.msra.gmra.mrb[4].mxu1 %vm363_vm1, %v347_v40 }
 0x376   :  { %v737_v45 = vpop.f32.mrb[4].mxu1 }
 0x377   :  { %v442_v46 = vadd.f32 %v737_v45, %v573_v44  ;;  %v436_v47 = vpop.f32.mrb[5].mxu1 }
 0x378   :  { %v437_v48 = vadd.f32 %v573_v44, %v436_v47 }
 0x379   :  { %v446_v50 = vmax.f32 %v442_v46, 0.0 }
 0x37a   :  { %v445_v49 = vmax.f32 %v437_v48, 0.0 }
 0x37c   :  { %770 = vmatprep.mubr.f32.mxu0 %v445_v49 }
 0x37d   :  { %771 = vmatmul.mubr.f32.vlgmr.msra.gmra.mrb[2].mxu0 %v446_v50 }
 0x450   :  { %v772_v52 = vpop.f32.mrb[2].mxu0 }
 0x451   :  { %v542_v53 = vadd.f32 %v772_v52, %v576_v51  ;;  %v536_v54 = vpop.f32.mrb[3].mxu0 }
 0x452   :  { %v537_v55 = vadd.f32 %v576_v51, %v536_v54 }
 0x453   :  { %547 = vst.msk [vmem:[%s1161_s11 + $0x8] sm:$0xff] %vm545_vm2, %v542_v53 }
 0x454   :  { %546 = vst.msk [vmem:[%s1161_s11] sm:$0xff] %vm545_vm2, %v537_v55  ;;  %550 = vrot.lane.b32.xlu0 %v537_v55, %s916_s2 }
 0x458   :  { %552 = vrot.lane.b32.xlu0 %v542_v53, %s916_s2 }
 0x4c6   :  { %v551_v56 = vpop.permute.xlu0 %550 }
 0x4c7   :  { %557 = vst.msk [vmem:[%s1162_s12] sm:$0xff] %vm556_vm3, %v551_v56 }
 0x4ca   :  { %v553_v57 = vpop.permute.xlu0 %552 }
 0x4cb   :  { %558 = vst.msk [vmem:[%s1162_s12 + $0x8] sm:$0xff] %vm556_vm3, %v553_v57 }
 0x4cc   :  { %567 = vsyncpa [#allocation3], 1 }

</bundles_post_ra>
